<compile_context>
chip_gen: v6e
topology: v6e:2x2x1
jax: 0.10.0
libtpu: 0.0.40
codegen_flags: <defaults>
</compile_context>

<pallas_src>
import functools

import jax
import jax.numpy as jnp
from jax import lax
from jax.experimental import pallas as pl
from jax.experimental.pallas import tpu as pltpu


def _round_up(x: int, m: int) -> int:
    return ((x + m - 1) // m) * m


def _embedding_padded_kernel(idx_ref, col_ref, table_ref, out_ref, *,
                             padding_idx: int):
    # idx_ref:   (TN, 1) int32   VMEM (token indices for this tile)
    # col_ref:   (TN, V) int32   VMEM (column-index iota, resident across steps)
    # table_ref: (V, D)  float32 VMEM (full embedding table, resident)
    # out_ref:   (TN, D) float32 VMEM
    ids = idx_ref[...]                                   # (TN, 1)
    # Fold the padding-row zeroing into the ids: padding tokens become -1,
    # which never matches a column index -> all-zero one-hot row.
    ids = jnp.where(ids == padding_idx, -1, ids)

    onehot = (col_ref[...] == ids).astype(jnp.float32)   # (TN, V), exact 0/1

    out_ref[...] = jnp.dot(
        onehot,
        table_ref[...],
        preferred_element_type=jnp.float32,
        # Keep the f32 gather bit-exact on bf16-native MXUs (v6e/v7x): the
        # one-hot is exactly representable in bf16, and HIGHEST decomposes the
        # f32 table exactly, so every gathered value is reproduced verbatim.
        precision=lax.Precision.HIGHEST,
    ).astype(out_ref.dtype)


def embedding_padded(idx: jax.Array, table: jax.Array, padding_idx: int,
                     *, tn: int = 256) -> jax.Array:
    """idx: (B, S) int, table: (V, D) float32 -> (B, S, D) float32."""
    b, s = idx.shape
    v, d = table.shape

    # PyTorch normalizes a negative padding_idx to V + padding_idx.
    if padding_idx < 0:
        padding_idx += v

    n = b * s
    # Token tile: multiple of 8 (f32/i32 sublane tiling); 256 by default to
    # fill the 256-wide MXU M dimension on v6e/v7x.  Clamp for tiny inputs so
    # we don't pad a handful of tokens up to a full 256-token tile.  For large
    # inputs this keeps grid >= 2, so ("parallel",) can shard the token axis
    # across both TensorCores on v7x.
    tn_eff = max(8, min(_round_up(tn, 8), _round_up(n, 8)))
    n_pad = _round_up(n, tn_eff)
    grid = n_pad // tn_eff

    idx_flat = idx.reshape(n).astype(jnp.int32)
    # Pad with padding_idx -> padded rows come out all-zero and are sliced off.
    idx_flat = jnp.pad(idx_flat, (0, n_pad - n), constant_values=padding_idx)
    idx_2d = idx_flat.reshape(n_pad, 1)

    # Column-index matrix for the one-hot compare; data-independent, passed as
    # an input with a constant index_map so it is DMA'd once and stays
    # resident in VMEM for every grid step.
    col = jnp.broadcast_to(jnp.arange(v, dtype=jnp.int32), (tn_eff, v))

    # --- VMEM budget guard (full table resident; v7x has 64 MiB physical /
    # 32 MiB default scoped VMEM, vs 128 MiB on v5e/v6e). ---
    itemsize = table.dtype.itemsize
    table_bytes = v * d * itemsize
    per_step_bytes = (tn_eff * 1 * 4          # idx tile
                      + tn_eff * d * itemsize  # out tile
                      )
    vmem_est = table_bytes + tn_eff * v * 4 + 2 * per_step_bytes  # 2x: double buffering
    params = {"dimension_semantics": ("parallel",)}
    if vmem_est > (28 << 20):
        # Raise the scoped VMEM limit (leave headroom below 64 MiB for v7x).
        params["vmem_limit_bytes"] = min(int(vmem_est * 2), 56 << 20)
    # TODO(synk): for very large V*D tables that cannot fit VMEM (first hit on
    # v7x), switch to keeping the table in HBM (memory_space=pl.ANY) with a
    # scalar-prefetch-driven manual-DMA row gather instead of the resident
    # one-hot matmul.

    kernel = functools.partial(_embedding_padded_kernel, padding_idx=padding_idx)

    out = pl.pallas_call(
        kernel,
        out_shape=jax.ShapeDtypeStruct((n_pad, d), table.dtype),
        grid_spec=pl.GridSpec(
            grid=(grid,),
            in_specs=[
                pl.BlockSpec((tn_eff, 1), lambda i: (i, 0)),  # token indices tile
                pl.BlockSpec((tn_eff, v), lambda i: (0, 0)),  # resident column iota
                pl.BlockSpec((v, d), lambda i: (0, 0)),       # resident table
            ],
            out_specs=pl.BlockSpec((tn_eff, d), lambda i: (i, 0)),
        ),
        compiler_params=pltpu.CompilerParams(**params),
    )(idx_2d, col, table)

    return out[:n].reshape(b, s, d)


def initialize_embeddings(key, shape):
    # Deterministic synthetic init (matches tools.initialize_embeddings style:
    # normal with std = sqrt(2 / (rows + cols))).
    v, d = shape
    return jax.random.normal(key, shape, dtype=jnp.float32) * (2.0 / (v + d)) ** 0.5


def _reference(idx, table, padding_idx):
    v = table.shape[0]
    if padding_idx < 0:
        padding_idx += v
    padding_mult = jnp.ones((v, 1), jnp.float32).at[padding_idx].set(0.0)
    return (table * padding_mult)[idx]


if __name__ == "__main__":
    key = jax.random.PRNGKey(0)
    k_emb, k_idx1, k_idx2 = jax.random.split(key, 3)

    num_embeddings = 40   # vocab size V
    embedding_dim = 32    # D
    padding_idx = 0

    table = initialize_embeddings(k_emb, (num_embeddings, embedding_dim))

    # --- Case 1: small shape from the module (batch=2, seq=8), grid of 1. ---
    batch, seq = 2, 8
    idx = jax.random.randint(k_idx1, (batch, seq), 0, num_embeddings,
                             dtype=jnp.int32)
    # force a few padding tokens to exercise the masking path
    idx = idx.at[0, 0].set(padding_idx).at[1, 3].set(padding_idx)

    out = jax.block_until_ready(embedding_padded(idx, table, padding_idx))
    ref = _reference(idx, table, padding_idx)
    assert out.shape == (batch, seq, embedding_dim)
    assert jnp.allclose(out, ref, atol=1e-6), "mismatch vs reference (case 1)"

    # --- Case 2: longer sequence -> multi-step grid (exercises tn=256 tiling,
    #     tail padding, and token-axis parallelism). ---
    batch2, seq2 = 2, 300
    idx2 = jax.random.randint(k_idx2, (batch2, seq2), 0, num_embeddings,
                              dtype=jnp.int32)
    idx2 = idx2.at[0, 17].set(padding_idx).at[1, 123].set(padding_idx)

    out2 = jax.block_until_ready(embedding_padded(idx2, table, padding_idx))
    ref2 = _reference(idx2, table, padding_idx)
    assert out2.shape == (batch2, seq2, embedding_dim)
    assert jnp.allclose(out2, ref2, atol=1e-6), "mismatch vs reference (case 2)"

    print("KERNEL_OK")
</pallas_src>

<mosaic_0001>
module attributes {stable_mosaic.version = 11 : i64} {
  func.func @_embedding_padded_kernel(%arg0: i32, %arg1: memref<16x1xi32, #tpu.memory_space<vmem>>, %arg2: memref<16x40xi32, #tpu.memory_space<vmem>>, %arg3: memref<40x32xf32, #tpu.memory_space<vmem>>, %arg4: memref<16x32xf32, #tpu.memory_space<vmem>>) attributes {dimension_semantics = [#tpu.dimension_semantics<parallel>], iteration_bounds = array<i64: 1>, scalar_prefetch = 0 : i64, scratch_operands = 0 : i64, tpu.core_type = #tpu.core_type<tc>, window_params = [{transform_indices = @transform_0, window_bounds = array<i64: 16, 1>}, {pipeline_mode = #tpu.pipeline_mode<synchronous>, transform_indices = @transform_1, window_bounds = array<i64: 16, 40>}, {pipeline_mode = #tpu.pipeline_mode<synchronous>, transform_indices = @transform_2, window_bounds = array<i64: 40, 32>}, {transform_indices = @transform_3, window_bounds = array<i64: 16, 32>}]} {
    %c0 = arith.constant 0 : index
    %c0_0 = arith.constant 0 : index
    %0 = vector.load %arg1[%c0, %c0_0] : memref<16x1xi32, #tpu.memory_space<vmem>>, vector<16x1xi32>
    %c0_i32 = arith.constant 0 : i32
    %1 = vector.broadcast %c0_i32 : i32 to vector<16x1xi32>
    %2 = arith.cmpi eq, %0, %1 : vector<16x1xi32>
    %c-1_i32 = arith.constant -1 : i32
    %3 = vector.broadcast %c-1_i32 : i32 to vector<16x1xi32>
    %4 = arith.select %2, %3, %0 : vector<16x1xi1>, vector<16x1xi32>
    %c0_1 = arith.constant 0 : index
    %c0_2 = arith.constant 0 : index
    %5 = vector.load %arg2[%c0_1, %c0_2] : memref<16x40xi32, #tpu.memory_space<vmem>>, vector<16x40xi32>
    %6 = vector.broadcast %4 : vector<16x1xi32> to vector<16x40xi32>
    %7 = arith.cmpi eq, %5, %6 : vector<16x40xi32>
    %8 = arith.extui %7 : vector<16x40xi1> to vector<16x40xi32>
    %9 = arith.sitofp %8 : vector<16x40xi32> to vector<16x40xf32>
    %c0_3 = arith.constant 0 : index
    %c0_4 = arith.constant 0 : index
    %10 = vector.load %arg3[%c0_3, %c0_4] : memref<40x32xf32, #tpu.memory_space<vmem>>, vector<40x32xf32>
    %cst = arith.constant dense<0.000000e+00> : vector<16x32xf32>
    %11 = tpu.matmul %9, %10, %cst {dimension_numbers = #tpu.dot_dimension_numbers<[1], [0], [0], [1], [0, 0, 1, 1], [], []>, precision = #tpu.contract_precision<fp32>} : vector<16x40xf32>, vector<40x32xf32>, vector<16x32xf32> -> vector<16x32xf32>
    %c0_5 = arith.constant 0 : index
    %c0_6 = arith.constant 0 : index
    %12 = vector.load %arg4[%c0_5, %c0_6] : memref<16x32xf32, #tpu.memory_space<vmem>>, vector<16x32xf32>
    tpu.vector_store %arg4[%c0_5, %c0_6], %11 {strides = array<i32>} : memref<16x32xf32, #tpu.memory_space<vmem>>, vector<16x32xf32>,
    return
  }
  func.func @transform_0(%arg0: i32) -> (i32, i32) {
    %c0_i32 = arith.constant 0 : i32
    %c0_i32_0 = arith.constant 0 : i32
    return %arg0, %c0_i32 : i32, i32
  }
  func.func @transform_1(%arg0: i32) -> (i32, i32) {
    %c0_i32 = arith.constant 0 : i32
    %c0_i32_0 = arith.constant 0 : i32
    %c0_i32_1 = arith.constant 0 : i32
    return %c0_i32, %c0_i32_0 : i32, i32
  }
  func.func @transform_2(%arg0: i32) -> (i32, i32) {
    %c0_i32 = arith.constant 0 : i32
    %c0_i32_0 = arith.constant 0 : i32
    %c0_i32_1 = arith.constant 0 : i32
    return %c0_i32, %c0_i32_0 : i32, i32
  }
  func.func @transform_3(%arg0: i32) -> (i32, i32) {
    %c0_i32 = arith.constant 0 : i32
    %c0_i32_0 = arith.constant 0 : i32
    return %arg0, %c0_i32 : i32, i32
  }
}

</mosaic_0001>

<bundles_post_ra>
// kernel: tpu_custom_call.1
= control target key start
LH: loop header
LB: loop body
LE: loop exit
PB: predicated region body
PF: predicated region fallthrough
CT: control target
= control target key end

     0   :  { %v763_v3 = vmov 0   ;;  %s926_s0 = inlined_call_operand.vmem [shape: s32[16,1], index: 0, kind: input, shape index: {}]   ;;  %s927_s1 = inlined_call_operand.vmem [shape: s32[16,40], index: 1, kind: input, shape index: {}]   ;;  %s928_s2 = inlined_call_operand.vmem [shape: f32[40,32], index: 2, kind: input, shape index: {}]   ;;  %s929_s3 = inlined_call_operand.hbm [shape: f32[16,32], index: 3, kind: output, shape index: {}]  }
   0x1   :  { %v15_v0 = vld [vmem:[%s926_s0] sm:$0xff]  ;;  %v16_v1 = vld [vmem:[%s926_s0 + $0x8] sm:$0xff]  ;;  %740 = vset.pattern.permute.xlu0 %v763_v3  ;;  %v38_v5 = vld [vmem:[%s928_s2 + $0x18] sm:$0xff] }
   0x2   :  { %v39_v2 = vld [vmem:[%s928_s2 + $0x20] sm:$0xff]  ;;  %vm17_vm0 = vcmp.eq.s32.totalorder %v15_v0, 0  ;;  %vm18_vm1 = vcmp.eq.s32.totalorder %v16_v1, 0  ;;  %v37_v6 = vld [vmem:[%s928_s2 + $0x10] sm:$0xff]  ;;  %v805_v8 = vand.u32 4294901760, %v38_v5  ;;  %v36_v10 = vld [vmem:[%s928_s2 + $0x8] sm:$0xff] }
   0x3   :  { %v797_v4 = vand.u32 4294901760, %v39_v2  ;;  %v19_v7 = vsel %vm17_vm0, 4294967295, %v15_v0  ;;  %v807_v9 = vand.u32 4294901760, %v37_v6  ;;  %v35_v11 = vld [vmem:[%s928_s2] sm:$0xff]  ;;  %v818_v13 = vand.u32 4294901760, %v36_v10 }
   0x4   :  { %24 = vperm.xlu0 %740, %v19_v7   ;;  %v820_v14 = vand.u32 4294901760, %v35_v11 }
   0x5   :  { %v816_v12 = vsub.f32 %v39_v2, %v797_v4  ;;  %657 = vmatprep.subr.mxu0 %v797_v4 }
   0x6   :  { %8 = vsyncpa [#allocation3], 0  ;;  %v20_v15 = vsel %vm18_vm1, 4294967295, %v16_v1  ;;  %v824_v16 = vsub.f32 %v38_v5, %v805_v8  ;;  %v827_v17 = vsub.f32 %v37_v6, %v807_v9  ;;  %658 = vmatpush3.msra.mxu0 %v797_v4  ;;  %v834_v19 = vsub.f32 %v36_v10, %v818_v13  ;;  %v21_v35 = vld [vmem:[%s927_s1] sm:$0xff]  ;;  %v22_v39 = vld [vmem:[%s927_s1 + $0x8] sm:$0xff]  ;;  %s765_s1 = smov [#allocation2]  }
   0x7   :  { %v831_v18 = vand.u32 4294901760, %v816_v12  ;;  %v837_v20 = vsub.f32 %v35_v11, %v820_v14  ;;  %659 = vmatprep.subr.mxu0 %v805_v8  ;;  %vm40_vm2 = vcmask 326656   ;;  %v764_v37 = vmov 0.0   ;;  %s596_s28 = sshll.u32 %s765_s1, 4  ;;  %s597_s28 = int_to_ptr.vmem [resolvable:$true] %s596_s28 }
   0x8   :  { %v841_v21 = vand.u32 4294901760, %v824_v16  ;;  %v844_v22 = vand.u32 4294901760, %v827_v17  ;;  %660 = vmatpush3.msra.mxu0 %v805_v8  ;;  %27 = vperm.xlu0 %740, %v20_v15   ;;  %v850_v24 = vand.u32 4294901760, %v834_v19  ;;  %vm588_vm5 = vcmask 261120   ;;  %s741_s29 = scalar_lea.vmem %s597_s28, 256  ;;  %p746_p1 = scmp.lt.s32.totalorder %s597_s28, %s597_s28 }
   0x9   :  { %v163_v23 = vsub.f32 %v816_v12, %v831_v18  ;;  %v853_v25 = vand.u32 4294901760, %v837_v20  ;;  %661 = vmatprep.subr.mxu0 %v807_v9  ;;  %p742_p0 = scmp.ne.s32.totalorder %s597_s28, %s741_s29  ;;  %p747_p2 = scmp.lt.s32.totalorder %s741_s29, %s741_s29 }
   0xa   :  { %v170_v26 = vsub.f32 %v824_v16, %v841_v21  ;;  %v177_v27 = vsub.f32 %v827_v17, %v844_v22  ;;  %662 = vmatpush3.msra.mxu0 %v807_v9  ;;  %v184_v29 = vsub.f32 %v834_v19, %v850_v24 }
   0xb   :  { %v164_v28 = vand.u32 4294901760, %v163_v23  ;;  %663 = vmatprep.subr.mxu0 %v818_v13  ;;  %v191_v32 = vsub.f32 %v837_v20, %v853_v25  ;;  %p748_p3 = por %p747_p2, %p746_p1 }
   0xc   :  { %v171_v30 = vand.u32 4294901760, %v170_v26  ;;  %664 = vmatpush3.msra.mxu0 %v818_v13  ;;  %v178_v31 = vand.u32 4294901760, %v177_v27  ;;  %v185_v33 = vand.u32 4294901760, %v184_v29 }
   0xd   :  { %670 = vmatprep.subr.mxu1 %v164_v28  ;;  %665 = vmatprep.subr.mxu0 %v820_v14  ;;  %v192_v34 = vand.u32 4294901760, %v191_v32  ;;  %p749_p4 = pnand %p748_p3, %p742_p0 }
   0xe   :  { %671 = vmatpush3.msra.mxu1 %v164_v28  ;;  %666 = vmatpush3.msra.mxu0 %v820_v14 }
   0xf   :  { %672 = vmatprep.subr.mxu1 %v171_v30  ;;  %683 = vmatprep.subr.mxu0 %v816_v12 }
  0x10   :  { %673 = vmatpush3.msra.mxu1 %v171_v30 }
  0x11   :  { %674 = vmatprep.subr.mxu1 %v178_v31 }
  0x12   :  { %675 = vmatpush3.msra.mxu1 %v178_v31 }
  0x13   :  { %676 = vmatprep.subr.mxu1 %v185_v33 }
  0x14   :  { %677 = vmatpush3.msra.mxu1 %v185_v33 }
  0x15   :  { %678 = vmatprep.subr.mxu1 %v192_v34 }
  0x16   :  { %679 = vmatpush3.msra.mxu1 %v192_v34 }
  0x17   :  { %696 = vmatprep.subr.mxu1 %v797_v4 }
  0x7f   :  { %v25_v36 = vpop.permute.xlu0 %24 }
  0x80   :  { %vm29_vm3 = vcmp.eq.s32.totalorder %v21_v35, %v25_v36 }
  0x81   :  { %v607_v38 = vsel %vm29_vm3, 1.0, %v764_v37 }
  0x82   :  { %v42_v40 = vsel %vm40_vm2, %v607_v38, 0  ;;  %680 = vmatprep.mubr.msk.f32.mxu1 %vm40_vm2, %v607_v38 }
  0x83   :  { %v118_v41 = vsub.f32 %v42_v40, %v42_v40  ;;  %v28_v42 = vpop.permute.xlu0 %27 }
  0x84   :  { %vm30_vm4 = vcmp.eq.s32.totalorder %v22_v39, %v28_v42 }
  0x85   :  { %v608_v43 = vsel %vm30_vm4, 1.0, %v764_v37  ;;  %v119_v44 = vand.u32 4294901760, %v118_v41 }
  0x86   :  { %v45_v45 = vsel %vm40_vm2, %v608_v43, 0  ;;  %681 = vmatmul.mubr.msk.f32.vlgmr.msra.gmra.mxu1 %vm40_vm2, %v608_v43 }
  0x87   :  { %v128_v46 = vsub.f32 %v45_v45, %v45_v45  ;;  %697 = vmatpush3.msra.mxu1 %v797_v4  ;;  %706 = vmatprep.mubr.f32.mxu1 %v119_v44  ;;  %v120_v47 = vsub.f32 %v118_v41, %v119_v44 }
  0x88   :  { %698 = vmatprep.subr.mxu1 %v805_v8 }
  0x89   :  { %699 = vmatpush3.msra.mxu1 %v805_v8  ;;  %v121_v48 = vand.u32 4294901760, %v120_v47  ;;  %v129_v49 = vand.u32 4294901760, %v128_v46 }
  0x8a   :  { %700 = vmatprep.subr.mxu1 %v807_v9 }
  0x8b   :  { %701 = vmatpush3.msra.mxu1 %v807_v9  ;;  %667 = vmatprep.mubr.f32.mxu0 %v121_v48  ;;  %v130_v50 = vsub.f32 %v128_v46, %v129_v49 }
  0x8c   :  { %702 = vmatprep.subr.mxu1 %v818_v13 }
  0x8d   :  { %703 = vmatpush3.msra.mxu1 %v818_v13  ;;  %v131_v51 = vand.u32 4294901760, %v130_v50 }
  0x8e   :  { %704 = vmatprep.subr.mxu1 %v820_v14 }
  0x8f   :  { %705 = vmatpush3.msra.mxu1 %v820_v14  ;;  %668 = vmatmul.mubr.f32.vlgmr.msra.gmra.mxu0 %v131_v51 }
  0x90   :  { %684 = vmatpush3.msra.mxu0 %v816_v12  ;;  %707 = vmatmul.mubr.f32.vlgmr.msra.gmra.mxu1 %v129_v49 }
  0x91   :  { %722 = vmatprep.subr.mxu1 %v797_v4  ;;  %685 = vmatprep.subr.mxu0 %v824_v16 }
  0x92   :  { %693 = vmatprep.mubr.f32.mxu0 %v118_v41  ;;  %723 = vmatpush3.msra.mxu1 %v797_v4 }
  0x93   :  { %732 = vmatprep.mubr.msk.f32.mxu1 %vm40_vm2, %v607_v38  ;;  %686 = vmatpush3.msra.mxu0 %v824_v16 }
  0x94   :  { %724 = vmatprep.subr.mxu1 %v805_v8  ;;  %687 = vmatprep.subr.mxu0 %v827_v17 }
  0x95   :  { %725 = vmatpush3.msra.mxu1 %v805_v8  ;;  %688 = vmatpush3.msra.mxu0 %v827_v17 }
  0x96   :  { %726 = vmatprep.subr.mxu1 %v807_v9  ;;  %689 = vmatprep.subr.mxu0 %v834_v19 }
  0x97   :  { %727 = vmatpush3.msra.mxu1 %v807_v9  ;;  %690 = vmatpush3.msra.mxu0 %v834_v19 }
  0x98   :  { %728 = vmatprep.subr.mxu1 %v818_v13  ;;  %691 = vmatprep.subr.mxu0 %v837_v20 }
  0x99   :  { %729 = vmatpush3.msra.mxu1 %v818_v13  ;;  %692 = vmatpush3.msra.mxu0 %v837_v20 }
  0x9a   :  { %730 = vmatprep.subr.mxu1 %v820_v14  ;;  %694 = vmatmul.mubr.f32.vlgmr.msra.gmra.mxu0 %v128_v46 }
  0x9b   :  { %709 = vmatprep.subr.mxu0 %v831_v18  ;;  %731 = vmatpush3.msra.mxu1 %v820_v14 }
  0x9c   :  { %710 = vmatpush3.msra.mxu0 %v831_v18  ;;  %719 = vmatprep.mubr.msk.f32.mxu0 %vm40_vm2, %v607_v38 }
  0x9d   :  { %733 = vmatmul.mubr.msk.f32.vlgmr.msra.gmra.mxu1 %vm40_vm2, %v608_v43  ;;  %711 = vmatprep.subr.mxu0 %v841_v21 }
  0x9e   :  { %712 = vmatpush3.msra.mxu0 %v841_v21 }
  0x9f   :  { %713 = vmatprep.subr.mxu0 %v844_v22 }
  0xa0   :  { %714 = vmatpush3.msra.mxu0 %v844_v22 }
  0xa1   :  { %715 = vmatprep.subr.mxu0 %v850_v24 }
  0xa2   :  { %716 = vmatpush3.msra.mxu0 %v850_v24 }
  0xa3   :  { %717 = vmatprep.subr.mxu0 %v853_v25 }
  0xa4   :  { %718 = vmatpush3.msra.mxu0 %v853_v25 }
  0xa5   :  { %720 = vmatmul.mubr.msk.f32.vlgmr.msra.gmra.mxu0 %vm40_vm2, %v608_v43 }
 0x146   :  { %v682_v53 = vpop.f32.mrf.mxu1 }
 0x148   :  { %v229_v56 = vpop.f32.mrf.mxu1 }
 0x14f   :  { %v669_v52 = vpop.f32.mrf.mxu0 }
 0x150   :  { %v236_v57 = vadd.f32 %v682_v53, %v669_v52  ;;  %v708_v58 = vpop.f32.mrf.mxu1 }
 0x151   :  { %v123_v54 = vpop.f32.mrf.mxu0 }
 0x152   :  { %v230_v60 = vadd.f32 %v229_v56, %v123_v54  ;;  %v402_v63 = vpop.f32.mrf.mxu1 }
 0x15a   :  { %v695_v55 = vpop.f32.mrf.mxu0 }
 0x15b   :  { %v325_v61 = vadd.f32 %v695_v55, %v236_v57 }
 0x15c   :  { %v317_v59 = vpop.f32.mrf.mxu0 }
 0x15d   :  { %v318_v62 = vadd.f32 %v317_v59, %v230_v60  ;;  %v411_v0 = vadd.f32 %v708_v58, %v325_v61  ;;  %v734_v1 = vpop.f32.mrf.mxu1 }
 0x15f   :  { %v403_v4 = vadd.f32 %v402_v63, %v318_v62  ;;  %v578_v8 = vpop.f32.mrf.mxu1 }
 0x165   :  { %v721_v2 = vpop.f32.mrf.mxu0 }
 0x166   :  { %v503_v3 = vadd.f32 %v721_v2, %v411_v0 }
 0x167   :  { %v496_v5 = vpop.f32.mrf.mxu0 }
 0x168   :  { %v585_v6 = vadd.f32 %v734_v1, %v503_v3  ;;  %v497_v7 = vadd.f32 %v496_v5, %v403_v4 }
 0x16a   :  { %590 = vst.msk [vmem:[#allocation2 + $0x8] sm:$0xff] %vm588_vm5, %v585_v6  ;;  %v579_v9 = vadd.f32 %v578_v8, %v497_v7 }
 0x16c   :  { %589 = vst.msk [vmem:[#allocation2] sm:$0xff] %vm588_vm5, %v579_v9 }
 0x16d   :  { %752 = shalt.err (!%p749_p4)
}
 0x16e   :  { %s766_s30 = smov 128   ;;  %s767_s4 = smov 8  }
 0x16f   :  { %602 = dma.vmem_to_hbm [thread:$0]  %s597_s28, 256, %s929_s3, [#allocation3], %s766_s30, %s766_s30, %s767_s4  }
 0x170   :  { %761 = dma.done.wait [#allocation3], 256  }
 0x171   :  { %762 = vsyncadd [#allocation3], 4294967040 }
 0x172   :  { %606 = vsyncpa [#allocation3], 1 }

</bundles_post_ra>
